<compile_context>
chip_gen: v5e
topology: v5e:2x2
jax: 0.10.0
libtpu: 0.0.40
codegen_flags: <defaults>
</compile_context>

<pallas_src>
import jax
import jax.numpy as jnp
from jax.experimental import pallas as pl
from jax.experimental.pallas import tpu as pltpu

GIN_EPS = 0.0        # GINConv eps (default, train_eps=False)
BN_EPS = 1e-5        # BatchNorm1d eps


def _round_up(x, m):
    return ((x + m - 1) // m) * m


# ---------------------------------------------------------------------------
# Kernel 1: aggregation (adj' @ x), Linear1 + ReLU, per-tile BN partial stats.
# ---------------------------------------------------------------------------
def _agg_mlp1_kernel(n_ref, adj_ref, x_ref, w1_ref, b1_ref, r_ref, stats_ref):
    i = pl.program_id(0)
    n_valid = n_ref[0, 0]

    # GIN sum-aggregation; the (1+eps) self-loop is already folded into adj on
    # the host. adj is streamed as bf16 (exact for small integer counts) and
    # cast to f32 here, so the matmul is bit-exact vs. an f32 adjacency.
    agg = jnp.dot(adj_ref[...].astype(jnp.float32), x_ref[...],
                  preferred_element_type=jnp.float32)                  # [TM, F]

    # Spectral-normalized Linear1 + ReLU.
    z1 = jnp.dot(agg, w1_ref[...], preferred_element_type=jnp.float32) + b1_ref[...]
    r = jnp.maximum(z1, 0.0)                                           # [TM, Hp]

    # Mask rows past the real node count so global BN statistics stay exact.
    tm = r.shape[0]
    row_ids = i * tm + jax.lax.broadcasted_iota(jnp.int32, r.shape, 0)
    r = jnp.where(row_ids < n_valid, r, 0.0)

    r_ref[...] = r

    # Per-tile partial statistics (sum, sum of squares) over the node axis.
    sums = jnp.sum(r, axis=0, keepdims=True)                           # [1, Hp]
    sumsq = jnp.sum(r * r, axis=0, keepdims=True)                      # [1, Hp]
    stats_ref[...] = jnp.concatenate([sums, sumsq], axis=0).reshape(stats_ref.shape)


# ---------------------------------------------------------------------------
# Kernel 2: reduce partial stats -> fused BN scale/shift, then Linear2.
# ---------------------------------------------------------------------------
def _bn_mlp2_kernel(invn_ref, stats_ref, r_ref, gamma_ref, beta_ref,
                    w2_ref, b2_ref, out_ref):
    inv_n = invn_ref[0, 0]

    totals = jnp.sum(stats_ref[...], axis=0)                           # [2, Hp]
    mean = totals[0:1, :] * inv_n                                      # [1, Hp]
    ex2 = totals[1:2, :] * inv_n
    var = jnp.maximum(ex2 - mean * mean, 0.0)                          # biased var

    # Fused BN: bn = r*scale + shift  (single FMA-shaped elementwise pass).
    scale = gamma_ref[...] * jax.lax.rsqrt(var + BN_EPS)
    shift = beta_ref[...] - mean * scale
    bn = r_ref[...] * scale + shift                                    # [TM, Hp]

    # Spectral-normalized Linear2.
    out_ref[...] = jnp.dot(bn, w2_ref[...], preferred_element_type=jnp.float32) + b2_ref[...]


# ---------------------------------------------------------------------------
# Host wrapper: padding, adjacency construction, two pipelined pallas_calls.
# ---------------------------------------------------------------------------
def gin_encoder_forward(x, edge_index, w1t, b1, gamma, beta, w2t, b2, *, row_tile=128):
    assert row_tile % 8 == 0, "row_tile must be a multiple of 8 (sublane)"
    N, F = x.shape
    H = w1t.shape[1]

    Hp = _round_up(max(H, 128), 128)       # lane-dense hidden dim
    Np = _round_up(N, row_tile)            # padded node count
    num_tiles = Np // row_tile

    # Dense adjacency (adj[dst, src] += 1) with the (1+eps) self-term folded in.
    src, dst = edge_index[0], edge_index[1]
    adj = jnp.zeros((N, N), dtype=jnp.float32).at[dst, src].add(1.0)
    adj = adj + (1.0 + GIN_EPS) * jnp.eye(N, dtype=jnp.float32)
    # bf16 is exact for integer counts <= 256 (simple graphs: counts are 1 or 2).
    adj_p = jnp.pad(adj, ((0, Np - N), (0, Np - N))).astype(jnp.bfloat16)

    x_p = jnp.pad(x, ((0, Np - N), (0, 0)))
    w1t_p = jnp.pad(w1t, ((0, 0), (0, Hp - H)))
    w2t_p = jnp.pad(w2t, ((0, Hp - H), (0, Hp - H)))
    b1_p = jnp.pad(b1, ((0, 0), (0, Hp - H)))
    b2_p = jnp.pad(b2, ((0, 0), (0, Hp - H)))
    gamma_p = jnp.pad(gamma, ((0, 0), (0, Hp - H)), constant_values=1.0)
    beta_p = jnp.pad(beta, ((0, 0), (0, Hp - H)))

    n_valid = jnp.array([[N]], dtype=jnp.int32)
    inv_n = jnp.array([[1.0 / N]], dtype=jnp.float32)

    cparams = pltpu.CompilerParams(
        dimension_semantics=("parallel",),
        vmem_limit_bytes=32 * 1024 * 1024,
    )

    # --- Pass 1: aggregation + MLP layer 1 + ReLU + partial BN stats ----------
    cost1 = pl.CostEstimate(
        flops=2 * Np * Np * F + 2 * Np * F * Hp,
        transcendentals=0,
        bytes_accessed=2 * Np * Np + 4 * (Np * F + F * Hp + Hp
                                          + Np * Hp + num_tiles * 2 * Hp),
    )
    r, stats = pl.pallas_call(
        _agg_mlp1_kernel,
        out_shape=(jax.ShapeDtypeStruct((Np, Hp), jnp.float32),
                   jax.ShapeDtypeStruct((num_tiles, 2, Hp), jnp.float32)),
        grid=(num_tiles,),
        in_specs=[
            pl.BlockSpec(memory_space=pltpu.MemorySpace.SMEM),          # n_valid
            pl.BlockSpec((row_tile, Np), lambda i: (i, 0)),             # adj rows (bf16)
            pl.BlockSpec((Np, F), lambda i: (0, 0)),                    # x (resident)
            pl.BlockSpec((F, Hp), lambda i: (0, 0)),                    # W1^T (SN)
            pl.BlockSpec((1, Hp), lambda i: (0, 0)),                    # b1
        ],
        out_specs=(pl.BlockSpec((row_tile, Hp), lambda i: (i, 0)),      # r
                   pl.BlockSpec((1, 2, Hp), lambda i: (i, 0, 0))),      # partial stats
        compiler_params=cparams,
        cost_estimate=cost1,
    )(n_valid, adj_p, x_p, w1t_p, b1_p)

    # --- Pass 2: BN normalize (global stats) + MLP layer 2 --------------------
    cost2 = pl.CostEstimate(
        flops=2 * Np * Hp * Hp + 6 * Np * Hp,
        transcendentals=Hp,
        bytes_accessed=4 * (num_tiles * 2 * Hp + Np * Hp + 4 * Hp
                            + Hp * Hp + Np * Hp),
    )
    out_p = pl.pallas_call(
        _bn_mlp2_kernel,
        out_shape=jax.ShapeDtypeStruct((Np, Hp), jnp.float32),
        grid=(num_tiles,),
        in_specs=[
            pl.BlockSpec(memory_space=pltpu.MemorySpace.SMEM),          # 1/N
            pl.BlockSpec((num_tiles, 2, Hp), lambda i: (0, 0, 0)),      # partial stats
            pl.BlockSpec((row_tile, Hp), lambda i: (i, 0)),             # r
            pl.BlockSpec((1, Hp), lambda i: (0, 0)),                    # gamma
            pl.BlockSpec((1, Hp), lambda i: (0, 0)),                    # beta
            pl.BlockSpec((Hp, Hp), lambda i: (0, 0)),                   # W2^T (SN)
            pl.BlockSpec((1, Hp), lambda i: (0, 0)),                    # b2
        ],
        out_specs=pl.BlockSpec((row_tile, Hp), lambda i: (i, 0)),
        compiler_params=cparams,
        cost_estimate=cost2,
    )(inv_n, stats, r, gamma_p, beta_p, w2t_p, b2_p)

    return out_p[:N, :H]


def spectral_normalize(w):
    """Divide weight by its largest singular value (exact, converged spectral norm)."""
    sigma = jnp.linalg.svd(w, compute_uv=False)[0]
    return w / sigma


def reference_forward(adj, x, w1t, b1, gamma, beta, w2t, b2):
    agg = adj @ x
    h = (1.0 + GIN_EPS) * x + agg
    z1 = h @ w1t + b1
    r = jnp.maximum(z1, 0.0)
    mean = jnp.mean(r, axis=0, keepdims=True)
    var = jnp.mean((r - mean) ** 2, axis=0, keepdims=True)
    bn = (r - mean) / jnp.sqrt(var + BN_EPS) * gamma + beta
    return bn @ w2t + b2


if __name__ == "__main__":
    key = jax.random.PRNGKey(0)
    N, nfeat, nhid, E = 20, 8, 32, 60   # N not a multiple of the row tile -> exercises masking

    k_x, k_src, k_dst, k_w1, k_b1, k_w2, k_b2 = jax.random.split(key, 7)

    # Node features and random directed edge list.
    x = jax.random.normal(k_x, (N, nfeat), dtype=jnp.float32)
    src = jax.random.randint(k_src, (E,), 0, N, dtype=jnp.int32)
    dst = jax.random.randint(k_dst, (E,), 0, N, dtype=jnp.int32)
    edge_index = jnp.stack([src, dst], axis=0)                       # [2, E]

    # Deterministic parameter init (nn.Linear-style uniform), then spectral norm.
    lim1 = 1.0 / jnp.sqrt(nfeat)
    w1 = jax.random.uniform(k_w1, (nhid, nfeat), jnp.float32, -lim1, lim1)
    b1 = jax.random.uniform(k_b1, (1, nhid), jnp.float32, -lim1, lim1)
    lim2 = 1.0 / jnp.sqrt(nhid)
    w2 = jax.random.uniform(k_w2, (nhid, nhid), jnp.float32, -lim2, lim2)
    b2 = jax.random.uniform(k_b2, (1, nhid), jnp.float32, -lim2, lim2)

    w1t = spectral_normalize(w1).T      # [nfeat, nhid]
    w2t = spectral_normalize(w2).T      # [nhid, nhid]

    gamma = jnp.ones((1, nhid), dtype=jnp.float32)   # BatchNorm1d affine init
    beta = jnp.zeros((1, nhid), dtype=jnp.float32)

    # Small row tile so the demo exercises the multi-tile (pipelined) path.
    out = gin_encoder_forward(x, edge_index, w1t, b1, gamma, beta, w2t, b2, row_tile=8)
    jax.block_until_ready(out)

    # Pure-JAX reference on the un-padded, f32 adjacency.
    adj_ref = jnp.zeros((N, N), dtype=jnp.float32).at[edge_index[1], edge_index[0]].add(1.0)
    ref = reference_forward(adj_ref, x, w1t, b1, gamma, beta, w2t, b2)

    assert out.shape == (N, nhid)
    assert jnp.allclose(out, ref, atol=1e-4, rtol=1e-4), "mismatch vs reference"

    print("KERNEL_OK")
</pallas_src>

<mosaic_0001>
module attributes {stable_mosaic.version = 11 : i64} {
  func.func @_agg_mlp1_kernel(%arg0: i32, %arg1: memref<1x1xi32, #tpu.memory_space<smem>>, %arg2: memref<8x24xbf16, #tpu.memory_space<vmem>>, %arg3: memref<24x8xf32, #tpu.memory_space<vmem>>, %arg4: memref<8x128xf32, #tpu.memory_space<vmem>>, %arg5: memref<1x128xf32, #tpu.memory_space<vmem>>, %arg6: memref<8x128xf32, #tpu.memory_space<vmem>>, %arg7: memref<1x2x128xf32, #tpu.memory_space<vmem>>) attributes {dimension_semantics = [#tpu.dimension_semantics<parallel>], iteration_bounds = array<i64: 3>, scalar_prefetch = 0 : i64, scratch_operands = 0 : i64, tpu.core_type = #tpu.core_type<tc>, window_params = [{transform_indices = @transform_0, window_bounds = array<i64: 1, 1>}, {transform_indices = @transform_1, window_bounds = array<i64: 8, 24>}, {pipeline_mode = #tpu.pipeline_mode<synchronous>, transform_indices = @transform_2, window_bounds = array<i64: 24, 8>}, {pipeline_mode = #tpu.pipeline_mode<synchronous>, transform_indices = @transform_3, window_bounds = array<i64: 8, 128>}, {pipeline_mode = #tpu.pipeline_mode<synchronous>, transform_indices = @transform_4, window_bounds = array<i64: 1, 128>}, {transform_indices = @transform_5, window_bounds = array<i64: 8, 128>}, {transform_indices = @transform_6, window_bounds = array<i64: 1, 2, 128>}]} {
    %c0 = arith.constant 0 : index
    %c0_0 = arith.constant 0 : index
    %0 = memref.load %arg1[%c0, %c0_0] : memref<1x1xi32, #tpu.memory_space<smem>>
    %c0_1 = arith.constant 0 : index
    %c0_2 = arith.constant 0 : index
    %1 = vector.load %arg2[%c0_1, %c0_2] : memref<8x24xbf16, #tpu.memory_space<vmem>>, vector<8x24xbf16>
    %2 = arith.extf %1 : vector<8x24xbf16> to vector<8x24xf32>
    %c0_3 = arith.constant 0 : index
    %c0_4 = arith.constant 0 : index
    %3 = vector.load %arg3[%c0_3, %c0_4] : memref<24x8xf32, #tpu.memory_space<vmem>>, vector<24x8xf32>
    %cst = arith.constant dense<0.000000e+00> : vector<8x8xf32>
    %4 = tpu.matmul %2, %3, %cst {dimension_numbers = #tpu.dot_dimension_numbers<[1], [0], [0], [1], [0, 0, 1, 1], [], []>} : vector<8x24xf32>, vector<24x8xf32>, vector<8x8xf32> -> vector<8x8xf32>
    %c0_5 = arith.constant 0 : index
    %c0_6 = arith.constant 0 : index
    %5 = vector.load %arg4[%c0_5, %c0_6] : memref<8x128xf32, #tpu.memory_space<vmem>>, vector<8x128xf32>
    %cst_7 = arith.constant dense<0.000000e+00> : vector<8x128xf32>
    %6 = tpu.matmul %4, %5, %cst_7 {dimension_numbers = #tpu.dot_dimension_numbers<[1], [0], [0], [1], [0, 0, 1, 1], [], []>} : vector<8x8xf32>, vector<8x128xf32>, vector<8x128xf32> -> vector<8x128xf32>
    %c0_8 = arith.constant 0 : index
    %c0_9 = arith.constant 0 : index
    %7 = vector.load %arg5[%c0_8, %c0_9] : memref<1x128xf32, #tpu.memory_space<vmem>>, vector<1x128xf32>
    %8 = vector.broadcast %7 : vector<1x128xf32> to vector<8x128xf32>
    %9 = arith.addf %6, %8 : vector<8x128xf32>
    %cst_10 = arith.constant 0.000000e+00 : f32
    %10 = vector.broadcast %cst_10 : f32 to vector<8x128xf32>
    %11 = arith.maximumf %9, %10 : vector<8x128xf32>
    %c8_i32 = arith.constant 8 : i32
    %12 = arith.muli %arg0, %c8_i32 : i32
    %13 = tpu.iota {dimensions = array<i32: 0>} : vector<8x128xi32>
    %14 = vector.broadcast %12 : i32 to vector<8x128xi32>
    %15 = arith.addi %14, %13 : vector<8x128xi32>
    %16 = vector.broadcast %0 : i32 to vector<8x128xi32>
    %17 = arith.cmpi slt, %15, %16 : vector<8x128xi32>
    %cst_11 = arith.constant 0.000000e+00 : f32
    %18 = vector.broadcast %cst_11 : f32 to vector<8x128xf32>
    %19 = arith.select %17, %11, %18 : vector<8x128xi1>, vector<8x128xf32>
    %c0_12 = arith.constant 0 : index
    %c0_13 = arith.constant 0 : index
    %20 = vector.load %arg6[%c0_12, %c0_13] : memref<8x128xf32, #tpu.memory_space<vmem>>, vector<8x128xf32>
    tpu.vector_store %arg6[%c0_12, %c0_13], %19 {strides = array<i32>} : memref<8x128xf32, #tpu.memory_space<vmem>>, vector<8x128xf32>,
    %cst_14 = arith.constant dense<0.000000e+00> : vector<128xf32>
    %21 = vector.multi_reduction <add>, %19, %cst_14 [0] : vector<8x128xf32> to vector<128xf32>
    %22 = vector.shape_cast %21 : vector<128xf32> to vector<1x128xf32>
    %23 = arith.mulf %19, %19 : vector<8x128xf32>
    %cst_15 = arith.constant dense<0.000000e+00> : vector<128xf32>
    %24 = vector.multi_reduction <add>, %23, %cst_15 [0] : vector<8x128xf32> to vector<128xf32>
    %25 = vector.shape_cast %24 : vector<128xf32> to vector<1x128xf32>
    %26 = tpu.concatenate %22, %25 in 0 : vector<1x128xf32>, vector<1x128xf32> -> vector<2x128xf32>
    %27 = vector.shape_cast %26 : vector<2x128xf32> to vector<1x2x128xf32>
    %c0_16 = arith.constant 0 : index
    %c0_17 = arith.constant 0 : index
    %c0_18 = arith.constant 0 : index
    %28 = vector.load %arg7[%c0_16, %c0_17, %c0_18] : memref<1x2x128xf32, #tpu.memory_space<vmem>>, vector<1x2x128xf32>
    tpu.vector_store %arg7[%c0_16, %c0_17, %c0_18], %27 {strides = array<i32>} : memref<1x2x128xf32, #tpu.memory_space<vmem>>, vector<1x2x128xf32>,
    return
  }
  func.func @transform_0(%arg0: i32) -> (i32, i32) {
    %c0_i32 = arith.constant 0 : i32
    %c0_i32_0 = arith.constant 0 : i32
    %c0_i32_1 = arith.constant 0 : i32
    return %c0_i32, %c0_i32_0 : i32, i32
  }
  func.func @transform_1(%arg0: i32) -> (i32, i32) {
    %c0_i32 = arith.constant 0 : i32
    %c0_i32_0 = arith.constant 0 : i32
    return %arg0, %c0_i32 : i32, i32
  }
  func.func @transform_2(%arg0: i32) -> (i32, i32) {
    %c0_i32 = arith.constant 0 : i32
    %c0_i32_0 = arith.constant 0 : i32
    %c0_i32_1 = arith.constant 0 : i32
    return %c0_i32, %c0_i32_0 : i32, i32
  }
  func.func @transform_3(%arg0: i32) -> (i32, i32) {
    %c0_i32 = arith.constant 0 : i32
    %c0_i32_0 = arith.constant 0 : i32
    %c0_i32_1 = arith.constant 0 : i32
    return %c0_i32, %c0_i32_0 : i32, i32
  }
  func.func @transform_4(%arg0: i32) -> (i32, i32) {
    %c0_i32 = arith.constant 0 : i32
    %c0_i32_0 = arith.constant 0 : i32
    %c0_i32_1 = arith.constant 0 : i32
    return %c0_i32, %c0_i32_0 : i32, i32
  }
  func.func @transform_5(%arg0: i32) -> (i32, i32) {
    %c0_i32 = arith.constant 0 : i32
    %c0_i32_0 = arith.constant 0 : i32
    return %arg0, %c0_i32 : i32, i32
  }
  func.func @transform_6(%arg0: i32) -> (i32, i32, i32) {
    %c0_i32 = arith.constant 0 : i32
    %c0_i32_0 = arith.constant 0 : i32
    %c0_i32_1 = arith.constant 0 : i32
    return %arg0, %c0_i32, %c0_i32_0 : i32, i32, i32
  }
}

</mosaic_0001>

<bundles_post_ra>
// kernel: tpu_custom_call.1
= control target key start
LH: loop header
LB: loop body
LE: loop exit
PB: predicated region body
PF: predicated region fallthrough
CT: control target
= control target key end

     0   :  { %s786_s0 = inlined_call_operand.<no memory space> [shape: s32[1,1], index: 0, kind: input, shape index: {}]   ;;  %s787_s1 = inlined_call_operand.vmem [shape: bf16[24,24], index: 1, kind: input, shape index: {}]   ;;  %s788_s2 = inlined_call_operand.vmem [shape: f32[24,8], index: 2, kind: input, shape index: {}]   ;;  %s789_s3 = inlined_call_operand.vmem [shape: f32[8,128], index: 3, kind: input, shape index: {}]   ;;  %s790_s4 = inlined_call_operand.vmem [shape: f32[1,128], index: 4, kind: input, shape index: {}]   ;;  %s791_s5 = inlined_call_operand.hbm [shape: f32[24,128], index: 5, kind: output, shape index: {0}]   ;;  %s792_s6 = inlined_call_operand.hbm [shape: f32[3,2,128], index: 6, kind: output, shape index: {1}]  }
   0x1   :  { %12 = sst [smem:[#allocation2]] %s786_s0 }
   0x2   :  { %13 = vsyncpa [#allocation4], 0 }
   0x3   :  { %15 = vsyncpa [#allocation4 + $0x1], 0 }
   0x4   :  { %16 = vsyncpa [#allocation6], 0 }
   0x5   :  { %18 = vsyncpa [#allocation6 + $0x1], 0  ;;  %s666_s23 = smov 0   ;;  %s668_s24 = smov 0  }
   0x6   :  { %s670_s25 = smov 0   ;;  %s672_s26 = smov 0  }
   0x7 LB: > { %s687_s0 = sadd.s32 4294967295, %s626_s26   ;;  %s471_s27 = sadd.s32 4294967294, %s626_s26   ;;  %s626_s26 = sphi %s672_s26, %s798_s26   ;;  %s622_s25 = sphi %s670_s25, %s797_s25   ;;  %s618_s24 = sphi %s668_s24, %s796_s24   ;;  %s614_s23 = sphi %s666_s23, %s795_s23  }
   0x8   : > { %s691_s28 = sadd.s32 1, %s626_s26   ;;  %s141_s29 = sadd.s32 1, %s622_s25 }
   0x9   : > { %s138_s30 = ssub.s32 %s626_s26, %s691_s28  ;;  %p151_p0 = scmp.ne.s32.totalorder %s622_s25, %s618_s24 }
   0xa   : > { %p139_p1 = scmp.eq.s32.totalorder %s138_s30, 0  ;;  %p152_p2 = scmp.eq.s32.totalorder %s687_s0, 2 }
   0xb   : > { %p157_p3 = scmp.ne.s32.totalorder %s618_s24, %s614_s23  ;;  %p158_p4 = scmp.eq.s32.totalorder %s471_s27, 2 }
   0xc   : > { %s702_s7 = scalar_select %p139_p1, %s622_s25, %s141_s29  }
   0xd   : > { %p704_p5 = por %p152_p2, %p151_p0  ;;  %p708_p6 = por %p158_p4, %p157_p3 }
   0xe   : > { %p474_p7 = scmp.ge.s32.totalorder %s626_s26, 1  ;;  %p221_p8 = scmp.lt.s32.totalorder %s626_s26, 4 }
  0x10   : > { %p222_p9 = pnand %p474_p7, %p221_p8 }
  0x11   : > { %p255_p10 = scmp.lt.s32.totalorder (!%p222_p9), %s687_s0, 2  ;;  %s259_s27 = sld [smem:[#allocation2]] (!%p222_p9) }
  0x12   : > { %225 = sbr.rel (%p222_p9) target bundleno = 305 (0x131), region = 40  ;;  %s480_s29 = sshll.u32 (!%p222_p9), %s687_s0, 3 }
  0x13   : > { %s733_s30 = sand.u32 (!%p222_p9), 1, %s618_s24   ;;  %s360_s15 = scalar_lea.hbm (!%p222_p9), %s791_s5, %s480_s29 }
  0x14   : > { %s475_s12 = sshll.u32 (!%p222_p9), %s733_s30, 3  ;;  %s364_s18 = sshll.u32 (!%p222_p9), %s360_s15, 4  ;;  %s365_s18 = int_to_ptr.hbm [resolvable:$true] %s364_s18 }
  0x15   : > { %s345_s19 = scalar_lea.sflag (!%p222_p9), [#allocation4], %s733_s30 }
  0x17   : > { %v264_v0 = vld [vmem:[%s788_s2 + $0x10] sm:$0xff]  ;;  %v263_v1 = vld [vmem:[%s788_s2 + $0x8] sm:$0xff]  ;;  %v262_v2 = vld [vmem:[%s788_s2] sm:$0xff]  ;;  %s256_s16 = scalar_select %p255_p10, %s687_s0, 2  ;;  %vm265_vm0 = vcmask 195584   ;;  %vm294_vm1 = vcmask 64512   ;;  %v320_v7 = vlaneseq  ;;  %v322_v9 = vstv %s480_s29 }
  0x18   : > { %282 = vmatpush.msra.mxu0 %v264_v0  ;;  %v289_v5 = vld [vmem:[%s789_s3] sm:$0xff]  ;;  %v324_v12 = vstv %s259_s27  ;;  %s552_s29 = scalar_lea.hbm %s791_s5, 24 }
  0x19   : > { %s477_s17 = sshll.u32 %s256_s16, 2  ;;  %313 = vmatpush.msra.mxu1 %v289_v5  ;;  %v321_v8 = vshrl.u32 %v320_v7, 7  ;;  %v531_v10 = vld [vmem:[%s790_s4] ss:$0 sm:$0xff]  ;;  %s247_s16 = scalar_lea.vmem [#allocation3], %s475_s12 }
  0x1a   : > { %283 = vmatpush.msra.mxu0 %v263_v1  ;;  %s258_s20 = scalar_lea.vmem %s787_s1, %s477_s17  ;;  %s362_s17 = sshll.u32 %s247_s16, 4  ;;  %s363_s17 = int_to_ptr.vmem [resolvable:$true] %s362_s17 }
  0x1b   : > { %v260_v3 = vld [vmem:[%s258_s20] sm:$0xf]  ;;  %v323_v11 = vadd.s32 %v322_v9, %v321_v8  ;;  %s546_s20 = sshra.s32 %s365_s18, 4  ;;  %s547_s20 = int_to_ptr.hbm [resolvable:$true] %s546_s20 }
  0x1c   : > { %284 = vmatpush.msra.mxu0 %v262_v2  ;;  %v261_v4 = vunpack.c.l.bf16 %v260_v3  ;;  %s548_s21 = scalar_lea.hbm %s547_s20, 8  ;;  %p553_p0 = scmp.lt.s32.totalorder %s547_s20, %s791_s5 }
  0x1d   : > { %vm325_vm2 = vcmp.lt.s32.totalorder %v323_v11, %v324_v12  ;;  %p549_p11 = scmp.ne.s32.totalorder %s547_s20, %s548_s21  ;;  %p554_p1 = scmp.lt.s32.totalorder %s552_s29, %s548_s21 }
  0x1e   : > { %478 = vmatmul.msk.f32.vlgmr.msra.gmra.mxu0 %vm265_vm0, %v261_v4 }
  0x1f   : > { %p550_p12 = pnand %p549_p11, %p704_p5  ;;  %p555_p2 = por %p554_p1, %p553_p0 }
  0x21   : > { %p551_p13 = pneg %p550_p12 }
  0x23   : > { %p556_p3 = pnand %p555_p2, %p551_p13 }
  0x9b   : > { %v286_v6 = vpop.f32.mrf.mxu0 }
  0x9c   : > { %479 = vmatmul.msk.f32.vlgmr.msra.gmra.mxu1 %vm294_vm1, %v286_v6 }
 0x119   : > { %v315_v13 = vpop.f32.mrf.mxu1 }
 0x11a   : > { %v316_v14 = vadd.f32 %v531_v10, %v315_v13 }
 0x11c   : > { %v318_v15 = vmax.f32 %v316_v14, 0.0 }
 0x11e   : > { %v326_v16 = vsel %vm325_vm2, %v318_v15, 0.0 }
 0x11f   : > { %v328_v17 = vrot.slane %v326_v16, 4  ;;  %v334_v18 = vmul.f32 %v326_v16, %v326_v16  ;;  %327 = vst [vmem:[%s247_s16] sm:$0xff] %v326_v16 }
 0x120   : > { %559 = shalt.err (!%p556_p3)
}
 0x121   : > { %487 = dma.vmem_to_hbm [thread:$0]  (%p704_p5), %s363_s17, 128, %s365_s18, %s345_s19   ;;  %v329_v19 = vadd.f32 %v328_v17, %v326_v16  ;;  %v335_v20 = vrot.slane %v334_v18, 4  ;;  %vm341_vm3 = vcmask 1040384  }
 0x122   : > { %s476_s12 = sshll.u32 %s733_s30, 1  ;;  %s484_s13 = sshll.u32 %s687_s0, 1 }
 0x123   : > { %v330_v21 = vrot.slane %v329_v19, 2  ;;  %v336_v22 = vadd.f32 %v335_v20, %v334_v18  ;;  %s374_s16 = scalar_lea.hbm %s792_s6, %s484_s13  ;;  %s254_s20 = scalar_lea.vmem [#allocation5], %s476_s12 }
 0x124   : > { %s376_s21 = sshll.u32 %s254_s20, 4  ;;  %s378_s17 = sshll.u32 %s374_s16, 4  ;;  %s377_s21 = int_to_ptr.vmem [resolvable:$true] %s376_s21  ;;  %s379_s17 = int_to_ptr.hbm [resolvable:$true] %s378_s17 }
 0x125   : > { %v331_v23 = vadd.f32 %v330_v21, %v329_v19  ;;  %v337_v24 = vrot.slane %v336_v22, 2  ;;  %s350_s0 = scalar_lea.sflag [#allocation6], %s733_s30  ;;  %s574_s18 = sshra.s32 %s379_s17, 4  ;;  %s575_s18 = int_to_ptr.hbm [resolvable:$true] %s574_s18 }
 0x126   : > { %s576_s19 = scalar_lea.hbm %s575_s18, 2  ;;  %s580_s29 = scalar_lea.hbm %s792_s6, 6 }
 0x127   : > { %v332_v25 = vrot.slane %v331_v23, 1  ;;  %v338_v26 = vadd.f32 %v337_v24, %v336_v22  ;;  %p577_p4 = scmp.ne.s32.totalorder %s575_s18, %s576_s19  ;;  %p581_p9 = scmp.lt.s32.totalorder %s575_s18, %s792_s6 }
 0x128   : > { %p582_p10 = scmp.lt.s32.totalorder %s580_s29, %s576_s19 }
 0x129   : > { %v339_v27 = vrot.slane %v338_v26, 1  ;;  %v333_v28 = vadd.f32 %v332_v25, %v331_v23  ;;  %p578_p7 = pnand %p577_p4, %p704_p5 }
 0x12a   : > { %p583_p11 = por %p582_p10, %p581_p9 }
 0x12b   : > { %v340_v29 = vadd.f32 %v339_v27, %v338_v26  ;;  %p579_p8 = pneg %p578_p7 }
 0x12d   : > { %v342_v30 = vsel %vm341_vm3, %v333_v28, %v340_v29  ;;  %p584_p12 = pnand %p583_p11, %p579_p8 }
 0x12e   : > { %343 = vst [vmem:[%s254_s20] sm:$0x3] %v342_v30 }
 0x12f   : > { %587 = shalt.err (!%p584_p12)
}
 0x130   : > { %488 = dma.vmem_to_hbm [thread:$0]  (%p704_p5), %s377_s21, 32, %s379_s17, %s350_s0  }
 0x131 PF: > { %p498_p13 = scmp.ge.s32.totalorder %s626_s26, 2  ;;  %s390_s30 = sand.u32 1, %s614_s23  }
 0x132   : > { %s391_s12 = scalar_lea.sflag [#allocation4], %s390_s30 }
 0x133   : > { %p492_p0 = pnand %p498_p13, %p708_p6 }
 0x135   : > { %p493_p1 = pneg %p492_p0 }
 0x137   : > { %605 = dma.done.wait (%p493_p1), %s391_s12, 128  }
 0x138   : > { %607 = vsyncadd (%p493_p1), %s391_s12, 4294967168  ;;  %s401_s13 = scalar_lea.sflag [#allocation6], %s390_s30 }
 0x139   : > { %609 = dma.done.wait (%p493_p1), %s401_s13, 32  }
 0x13a   : > { %611 = vsyncadd (%p493_p1), %s401_s13, 4294967264  ;;  %p21_p5 = scmp.ge.s32.totalorder %s691_s28, 5   ;;  %s795_s23 = smov %s618_s24 }
 0x13b   : > { %s796_s24 = smov %s622_s25  ;;  %s797_s25 = smov %s702_s7 }
 0x13c   : > { %s798_s26 = smov %s691_s28  ;;  %23 = sbr.rel (!%p21_p5) target bundleno = 7 (0x7), region = 92 }
 0x141   :  { %407 = vsyncpa [#allocation4], 1 }
 0x142   :  { %409 = vsyncpa [#allocation4 + $0x1], 1 }
 0x143   :  { %410 = vsyncpa [#allocation6], 1 }
 0x144   :  { %412 = vsyncpa [#allocation6 + $0x1], 1 }

</bundles_post_ra>
